<compile_context>
chip_gen: v6e
topology: v6e:2x2x1
jax: 0.10.0
libtpu: 0.0.40
codegen_flags: <defaults>
</compile_context>

<pallas_src>
import functools

import jax
import jax.numpy as jnp
from jax.experimental import pallas as pl
from jax.experimental.pallas import tpu as pltpu


def _round_up(x, m):
    return ((x + m - 1) // m) * m


# ----------------------------------------------------------------------------
# 1x1 conv: tiled matmul + bias (MXU)
# ----------------------------------------------------------------------------
def _matmul_bias_kernel(x_ref, w_ref, b_ref, o_ref):
    acc = jnp.dot(x_ref[...], w_ref[...], preferred_element_type=jnp.float32)
    o_ref[...] = (acc + b_ref[...]).astype(o_ref.dtype)


def matmul_bias(x, w, b2d, out_dtype, tm=512):
    """x: (M, K), w: (K, N), b2d: (1, N) f32 -> (M, N).  Handles any M."""
    M, K = x.shape
    N = w.shape[1]
    tm = min(tm, _round_up(M, 8))          # big M tiles, 8-sublane aligned
    return pl.pallas_call(
        _matmul_bias_kernel,
        out_shape=jax.ShapeDtypeStruct((M, N), out_dtype),
        grid=(pl.cdiv(M, tm),),            # boundary block is masked, no assert
        in_specs=[
            pl.BlockSpec((tm, K), lambda i: (i, 0)),
            pl.BlockSpec((K, N), lambda i: (0, 0)),   # constant -> fetched once
            pl.BlockSpec((1, N), lambda i: (0, 0)),
        ],
        out_specs=pl.BlockSpec((tm, N), lambda i: (i, 0)),
        compiler_params=pltpu.CompilerParams(dimension_semantics=("parallel",)),
    )(x, w, b2d)


def conv1x1(x_nhwc, w, b, out_dtype, compute_dtype):
    """w: (Cin, Cout), b: (Cout,)."""
    n, h, wd, c = x_nhwc.shape
    out = matmul_bias(
        x_nhwc.reshape(n * h * wd, c).astype(compute_dtype),
        w.astype(compute_dtype),
        b.reshape(1, -1).astype(jnp.float32),
        out_dtype)
    return out.reshape(n, h, wd, -1)


# ----------------------------------------------------------------------------
# 3x3 conv (stride 1, pad 1): halo-slab DMA + 9 accumulated MXU matmuls.
# No im2col tensor is ever written to HBM.
# ----------------------------------------------------------------------------
_SLAB_EXTRA = 8  # slack rows so the (ky=2, kx=2) tap of the last row never reads
                 # past the slab allocation; the values read there only feed the
                 # padded output columns (>= W) that are sliced off before the store.


def _conv3x3_kernel(xflat_hbm, w_ref, b_ref, o_ref, slab, sem, *, wp):
    n = pl.program_id(0)
    i = pl.program_id(1)
    _, th, wdt, cout = o_ref.shape
    c = slab.shape[1]
    copy_rows = (th + 2) * wp          # row tile + 2-row halo, padded width wp

    cp = pltpu.make_async_copy(
        xflat_hbm.at[n, pl.ds(i * th * wp, copy_rows)],
        slab.at[pl.ds(0, copy_rows)],
        sem)
    cp.start()
    cp.wait()
    # TODO(synk): double-buffer this slab DMA across grid steps (needs core-aware
    # prefetch bookkeeping to stay correct when the grid is split across v7x cores).

    acc = jnp.zeros((th * wp, cout), jnp.float32)
    for k in range(9):
        ky, kx = divmod(k, 3)
        # flat row p = r*wp + col: slab row p + ky*wp + kx == padded pixel
        # (r + ky, col + kx)  ->  a 3x3 tap is just a shifted 2-D window.
        lhs = slab[pl.ds(ky * wp + kx, th * wp), :]
        acc = acc + jnp.dot(lhs, w_ref[k * c:(k + 1) * c, :],
                            preferred_element_type=jnp.float32)
    acc = acc + b_ref[...]                                  # bias in f32
    out = acc.reshape(th, wp, cout)[:, :wdt, :]             # drop padded columns
    o_ref[...] = out[None].astype(o_ref.dtype)


def conv3x3(x_nhwc, w, b, out_dtype, compute_dtype, target_m_rows=1024):
    """3x3 conv, stride 1, padding 1.  w: (3, 3, Cin, Cout), b: (Cout,)."""
    n, h, wd, c = x_nhwc.shape
    cout = w.shape[-1]
    wp = _round_up(wd + 2, 8)                    # padded row width, 8-aligned
    th = max(1, min(h, target_m_rows // wp))     # ~1024 matmul rows per tile
    hp = _round_up(h, th)
    grid_h = hp // th

    x = x_nhwc.astype(compute_dtype)
    # one HBM-side zero pad (conv padding + alignment padding), flattened to 2-D
    # rows so each halo slab is a single contiguous DMA.
    xp = jnp.pad(x, ((0, 0), (1, 1 + hp - h), (1, wp - wd - 1), (0, 0)))
    xflat = xp.reshape(n, (hp + 2) * wp, c)
    w2d = w.reshape(9 * c, cout).astype(compute_dtype)
    b2d = b.reshape(1, cout).astype(jnp.float32)

    return pl.pallas_call(
        functools.partial(_conv3x3_kernel, wp=wp),
        out_shape=jax.ShapeDtypeStruct((n, h, wd, cout), out_dtype),
        grid=(n, grid_h),
        in_specs=[
            pl.BlockSpec(memory_space=pl.ANY),                  # raw HBM, manual DMA
            pl.BlockSpec((9 * c, cout), lambda nn, ii: (0, 0)),  # weights: fetched once
            pl.BlockSpec((1, cout), lambda nn, ii: (0, 0)),
        ],
        out_specs=pl.BlockSpec((1, th, wd, cout), lambda nn, ii: (nn, ii, 0, 0)),
        scratch_shapes=[
            pltpu.VMEM(((th + 2) * wp + _SLAB_EXTRA, c), compute_dtype),
            pltpu.SemaphoreType.DMA,
        ],
        compiler_params=pltpu.CompilerParams(
            dimension_semantics=("parallel", "parallel")),
    )(xflat, w2d, b2d)


# ----------------------------------------------------------------------------
# Top-down merge: tiled (fused) nearest-upsample + add
# ----------------------------------------------------------------------------
def _upadd_kernel(f_ref, c_ref, o_ref):
    f = f_ref[...]                         # (1, tr,    Wf, C)
    c = c_ref[...]                         # (1, tr//r, Wf, C)
    r = f.shape[1] // c.shape[1]
    if r > 1:                              # fused 2x row repeat (leading-dim only)
        c = jnp.broadcast_to(c[:, :, None, :, :],
                             (1, c.shape[1], r, f.shape[2], f.shape[3]))
        c = c.reshape(f.shape)
    o_ref[...] = f + c


def _choose_row_tile(h, w, r, target_pixels=2048):
    t = max(1, min(h, target_pixels // max(w, 1)))
    return max(r, (t // r) * r)


def upsample_add(fine, coarse):
    """fine += F.interpolate(coarse, size=fine.shape[1:3], mode='nearest')."""
    n, hf, wf, c = fine.shape
    _, hc, wc, _ = coarse.shape

    # column upsample on the small (coarse) level only, in JAX.
    if wf == 2 * wc:
        cw = jnp.repeat(coarse, 2, axis=2)
    else:
        cw = jnp.take(coarse, (jnp.arange(wf) * wc) // wf, axis=2)

    # row upsample: fused into the Pallas kernel for the exact-2x case
    # (coarse BlockSpec reads half the row tile at the same block index).
    if hf == 2 * hc:
        r = 2
    else:
        cw = jnp.take(cw, (jnp.arange(hf) * hc) // hf, axis=1)
        r = 1

    tr = _choose_row_tile(hf, wf, r)
    return pl.pallas_call(
        _upadd_kernel,
        out_shape=jax.ShapeDtypeStruct(fine.shape, fine.dtype),
        grid=(n, pl.cdiv(hf, tr)),
        in_specs=[
            pl.BlockSpec((1, tr, wf, c), lambda b, i: (b, i, 0, 0)),
            pl.BlockSpec((1, tr // r, wf, c), lambda b, i: (b, i, 0, 0)),
        ],
        out_specs=pl.BlockSpec((1, tr, wf, c), lambda b, i: (b, i, 0, 0)),
        compiler_params=pltpu.CompilerParams(
            dimension_semantics=("parallel", "parallel")),
    )(fine, cw)


# ----------------------------------------------------------------------------
# FPN forward (add_extra_convs=False, start_level=0, end_level=-1)
# ----------------------------------------------------------------------------
def fpn_forward(inputs_nchw, params, num_outs, compute_dtype=jnp.float32):
    # NCHW -> NHWC so C maps to the 128-lane axis (lane-dense stores for C>=128).
    # TODO(synk): if the surrounding model can stay NHWC these transposes (a full
    # HBM round trip per level in each direction) disappear entirely.
    feats = [jnp.transpose(x, (0, 2, 3, 1)) for x in inputs_nchw]

    laterals = [
        conv1x1(feats[i], params["lat_w"][i], params["lat_b"][i],
                out_dtype=compute_dtype, compute_dtype=compute_dtype)
        for i in range(len(feats))
    ]

    # top-down pathway: tiled fused upsample + add
    for i in range(len(laterals) - 1, 0, -1):
        laterals[i - 1] = upsample_add(laterals[i - 1], laterals[i])

    outs = [
        conv3x3(laterals[i], params["fpn_w"][i], params["fpn_b"][i],
                out_dtype=jnp.float32, compute_dtype=compute_dtype)
        for i in range(len(laterals))
    ]

    # extra levels: max_pool2d(kernel=1, stride=2) == stride-2 subsampling
    # (pure strided data movement, left to XLA).
    while len(outs) < num_outs:
        outs.append(outs[-1][:, ::2, ::2, :])

    return tuple(jnp.transpose(o, (0, 3, 1, 2)) for o in outs)  # back to NCHW


# ----------------------------------------------------------------------------
# Pure-JAX reference (correctness check only)
# ----------------------------------------------------------------------------
def _conv_ref(x_nchw, w_oihw, b, pad):
    out = jax.lax.conv_general_dilated(
        x_nchw, w_oihw, (1, 1), [(pad, pad), (pad, pad)],
        dimension_numbers=("NCHW", "OIHW", "NCHW"))
    return out + b[None, :, None, None]


def _nearest_resize_nchw(x, oh, ow):
    _, _, h, w = x.shape
    rows = (jnp.arange(oh) * h) // oh
    cols = (jnp.arange(ow) * w) // ow
    return x[:, :, rows[:, None], cols[None, :]]


def fpn_forward_ref(inputs_nchw, params, num_outs):
    laterals = []
    for i, x in enumerate(inputs_nchw):
        w = jnp.transpose(params["lat_w"][i], (1, 0))[:, :, None, None]
        laterals.append(_conv_ref(x, w, params["lat_b"][i], 0))
    for i in range(len(laterals) - 1, 0, -1):
        _, _, H, W = laterals[i - 1].shape
        laterals[i - 1] = laterals[i - 1] + _nearest_resize_nchw(laterals[i], H, W)
    outs = []
    for i in range(len(laterals)):
        w = jnp.transpose(params["fpn_w"][i], (3, 2, 0, 1))
        outs.append(_conv_ref(laterals[i], w, params["fpn_b"][i], 1))
    while len(outs) < num_outs:
        outs.append(outs[-1][:, :, ::2, ::2])
    return tuple(outs)


# ----------------------------------------------------------------------------
# Deterministic synthetic parameters (xavier-uniform-ish)
# ----------------------------------------------------------------------------
def make_params(key, in_channels, out_channels):
    lat_w, lat_b, fpn_w, fpn_b = [], [], [], []
    for cin in in_channels:
        k1, k2, k3, k4, key = jax.random.split(key, 5)
        lim = (6.0 / (cin + out_channels)) ** 0.5
        lat_w.append(jax.random.uniform(k1, (cin, out_channels), jnp.float32, -lim, lim))
        lat_b.append(0.1 * jax.random.normal(k2, (out_channels,), jnp.float32))
        lim3 = (6.0 / (9 * out_channels + out_channels)) ** 0.5
        fpn_w.append(jax.random.uniform(
            k3, (3, 3, out_channels, out_channels), jnp.float32, -lim3, lim3))
        fpn_b.append(0.1 * jax.random.normal(k4, (out_channels,), jnp.float32))
    return {"lat_w": lat_w, "lat_b": lat_b, "fpn_w": fpn_w, "fpn_b": fpn_b}


# ----------------------------------------------------------------------------
# Test harness
# ----------------------------------------------------------------------------
def run_case(key, in_channels, spatials, out_channels, num_outs, batch,
             compute_dtype, tol):
    kp, kx = jax.random.split(key)
    params = make_params(kp, in_channels, out_channels)
    xkeys = jax.random.split(kx, len(in_channels))
    inputs = [jax.random.normal(xkeys[i], (batch, c, s, s), jnp.float32)
              for i, (c, s) in enumerate(zip(in_channels, spatials))]

    outs = jax.block_until_ready(
        fpn_forward(inputs, params, num_outs, compute_dtype=compute_dtype))
    refs = jax.block_until_ready(fpn_forward_ref(inputs, params, num_outs))

    assert len(outs) == num_outs
    for o, r in zip(outs, refs):
        assert o.shape == r.shape, (o.shape, r.shape)
        assert bool(jnp.all(jnp.isfinite(o)))
        if compute_dtype == jnp.float32:
            err = float(jnp.max(jnp.abs(o - r)))
            assert err < tol, err
        else:
            rel = float(jnp.linalg.norm((o - r).astype(jnp.float32)) /
                        (float(jnp.linalg.norm(r)) + 1e-6))
            assert rel < tol, rel


if __name__ == "__main__":
    # NOTE: out_channels=8 keeps the toy small; real FPN uses C=256 which is
    # lane-dense (multiple of 128) and fully utilizes the MXU / store path.
    root = jax.random.PRNGKey(0)
    k1, k2, k3 = jax.random.split(root, 3)

    # exact-2x pyramid, divisible shapes (fast fused-row-upsample path)
    run_case(k1, [4, 8, 16], [16, 8, 4], 8, 5, 2, jnp.float32, 1e-3)
    # ragged / non-2x shapes: exercises boundary (partial) tiles + general nearest path
    run_case(k2, [4, 8], [15, 8], 8, 3, 1, jnp.float32, 1e-3)
    # bf16 MXU path (f32 accumulation), checked by relative Frobenius norm
    run_case(k3, [4, 8, 16], [16, 8, 4], 8, 5, 2, jnp.bfloat16, 3e-2)

    print("KERNEL_OK")
</pallas_src>

<mosaic_0001>
module attributes {stable_mosaic.version = 11 : i64} {
  func.func @_matmul_bias_kernel(%arg0: i32, %arg1: memref<512x4xf32, #tpu.memory_space<vmem>>, %arg2: memref<4x8xf32, #tpu.memory_space<vmem>>, %arg3: memref<1x8xf32, #tpu.memory_space<vmem>>, %arg4: memref<512x8xf32, #tpu.memory_space<vmem>>) attributes {dimension_semantics = [#tpu.dimension_semantics<parallel>], iteration_bounds = array<i64: 1>, scalar_prefetch = 0 : i64, scratch_operands = 0 : i64, tpu.core_type = #tpu.core_type<tc>, window_params = [{transform_indices = @transform_0, window_bounds = array<i64: 512, 4>}, {pipeline_mode = #tpu.pipeline_mode<synchronous>, transform_indices = @transform_1, window_bounds = array<i64: 4, 8>}, {pipeline_mode = #tpu.pipeline_mode<synchronous>, transform_indices = @transform_2, window_bounds = array<i64: 1, 8>}, {transform_indices = @transform_3, window_bounds = array<i64: 512, 8>}]} {
    %c0 = arith.constant 0 : index
    %c0_0 = arith.constant 0 : index
    %0 = vector.load %arg1[%c0, %c0_0] : memref<512x4xf32, #tpu.memory_space<vmem>>, vector<512x4xf32>
    %c0_1 = arith.constant 0 : index
    %c0_2 = arith.constant 0 : index
    %1 = vector.load %arg2[%c0_1, %c0_2] : memref<4x8xf32, #tpu.memory_space<vmem>>, vector<4x8xf32>
    %cst = arith.constant dense<0.000000e+00> : vector<512x8xf32>
    %2 = tpu.matmul %0, %1, %cst {dimension_numbers = #tpu.dot_dimension_numbers<[1], [0], [0], [1], [0, 0, 1, 1], [], []>} : vector<512x4xf32>, vector<4x8xf32>, vector<512x8xf32> -> vector<512x8xf32>
    %c0_3 = arith.constant 0 : index
    %c0_4 = arith.constant 0 : index
    %3 = vector.load %arg3[%c0_3, %c0_4] : memref<1x8xf32, #tpu.memory_space<vmem>>, vector<1x8xf32>
    %4 = vector.broadcast %3 : vector<1x8xf32> to vector<512x8xf32>
    %5 = arith.addf %2, %4 : vector<512x8xf32>
    %c0_5 = arith.constant 0 : index
    %c0_6 = arith.constant 0 : index
    %6 = vector.load %arg4[%c0_5, %c0_6] : memref<512x8xf32, #tpu.memory_space<vmem>>, vector<512x8xf32>
    tpu.vector_store %arg4[%c0_5, %c0_6], %5 {strides = array<i32>} : memref<512x8xf32, #tpu.memory_space<vmem>>, vector<512x8xf32>,
    return
  }
  func.func @transform_0(%arg0: i32) -> (i32, i32) {
    %c0_i32 = arith.constant 0 : i32
    %c0_i32_0 = arith.constant 0 : i32
    return %arg0, %c0_i32 : i32, i32
  }
  func.func @transform_1(%arg0: i32) -> (i32, i32) {
    %c0_i32 = arith.constant 0 : i32
    %c0_i32_0 = arith.constant 0 : i32
    %c0_i32_1 = arith.constant 0 : i32
    return %c0_i32, %c0_i32_0 : i32, i32
  }
  func.func @transform_2(%arg0: i32) -> (i32, i32) {
    %c0_i32 = arith.constant 0 : i32
    %c0_i32_0 = arith.constant 0 : i32
    %c0_i32_1 = arith.constant 0 : i32
    return %c0_i32, %c0_i32_0 : i32, i32
  }
  func.func @transform_3(%arg0: i32) -> (i32, i32) {
    %c0_i32 = arith.constant 0 : i32
    %c0_i32_0 = arith.constant 0 : i32
    return %arg0, %c0_i32 : i32, i32
  }
}

</mosaic_0001>

<bundles_post_ra>
// kernel: tpu_custom_call.1
= control target key start
LH: loop header
LB: loop body
LE: loop exit
PB: predicated region body
PF: predicated region fallthrough
CT: control target
= control target key end

     0   :  { %vm279_vm0 = vcmask 1043456   ;;  %vm86_vm1 = vcmask 31744   ;;  %vm668_vm2 = vcmask 64512   ;;  %s1572_s1 = inlined_call_operand.vmem [shape: f32[4,8], index: 1, kind: input, shape index: {}]   ;;  %s1573_s0 = inlined_call_operand.vmem [shape: f32[512,4], index: 0, kind: input, shape index: {}]   ;;  %s1574_s2 = inlined_call_operand.vmem [shape: f32[1,8], index: 2, kind: input, shape index: {}]   ;;  %s1575_s3 = inlined_call_operand.vmem [shape: f32[512,8], index: 3, kind: output, shape index: {}]  }
   0x1   :  { %v78_v0 = vld [vmem:[%s1572_s1] sm:$0xf]  ;;  %v15_v3 = vld [vmem:[%s1573_s0 + $0x8] sm:$0xff]  ;;  %v16_v5 = vld [vmem:[%s1573_s0 + $0x10] sm:$0xff] }
   0x2   :  { %v14_v1 = vld [vmem:[%s1573_s0] sm:$0xff]  ;;  %868 = vmatprep.subr.msk.mxu0 %vm279_vm0, %v78_v0  ;;  %966 = vmatprep.subr.msk.mxu1 %vm279_vm0, %v78_v0  ;;  %v47_v4 = vld [vmem:[%s1573_s0 + $0x108] sm:$0xff]  ;;  %v48_v6 = vld [vmem:[%s1573_s0 + $0x110] sm:$0xff] }
   0x3   :  { %v46_v2 = vld [vmem:[%s1573_s0 + $0x100] sm:$0xff]  ;;  %869 = vmatpush3.msk.msra.mxu0 %vm279_vm0, %v78_v0  ;;  %967 = vmatpush3.msk.msra.mxu1 %vm279_vm0, %v78_v0  ;;  %v17_v7 = vld [vmem:[%s1573_s0 + $0x18] sm:$0xff]  ;;  %v19_v11 = vld [vmem:[%s1573_s0 + $0x28] sm:$0xff] }
   0x4   :  { %870 = vmatprep.mubr.msk.f32.mxu0 %vm86_vm1, %v14_v1  ;;  %918 = vmatprep.mubr.msk.f32.mxu1 %vm86_vm1, %v46_v2  ;;  %v49_v8 = vld [vmem:[%s1573_s0 + $0x118] sm:$0xff]  ;;  %v18_v9 = vld [vmem:[%s1573_s0 + $0x20] sm:$0xff]  ;;  %v51_v12 = vld [vmem:[%s1573_s0 + $0x128] sm:$0xff] }
   0x5   :  { %871 = vmatmul.mubr.msk.f32.vlgmr.msra.gmra.mxu0 %vm86_vm1, %v15_v3  ;;  %919 = vmatmul.mubr.msk.f32.vlgmr.msra.gmra.mxu1 %vm86_vm1, %v47_v4  ;;  %v50_v10 = vld [vmem:[%s1573_s0 + $0x120] sm:$0xff]  ;;  %v20_v13 = vld [vmem:[%s1573_s0 + $0x30] sm:$0xff]  ;;  %v21_v15 = vld [vmem:[%s1573_s0 + $0x38] sm:$0xff] }
   0x6   :  { %873 = vmatprep.mubr.msk.f32.mxu0 %vm86_vm1, %v16_v5  ;;  %921 = vmatprep.mubr.msk.f32.mxu1 %vm86_vm1, %v48_v6  ;;  %v52_v14 = vld [vmem:[%s1573_s0 + $0x130] sm:$0xff]  ;;  %v53_v16 = vld [vmem:[%s1573_s0 + $0x138] sm:$0xff]  ;;  %v22_v17 = vld [vmem:[%s1573_s0 + $0x40] sm:$0xff] }
   0x7   :  { %v54_v18 = vld [vmem:[%s1573_s0 + $0x140] sm:$0xff]  ;;  %v23_v19 = vld [vmem:[%s1573_s0 + $0x48] sm:$0xff]  ;;  %v24_v21 = vld [vmem:[%s1573_s0 + $0x50] sm:$0xff] }
   0x8   :  { %v55_v20 = vld [vmem:[%s1573_s0 + $0x148] sm:$0xff]  ;;  %v56_v22 = vld [vmem:[%s1573_s0 + $0x150] sm:$0xff]  ;;  %v25_v23 = vld [vmem:[%s1573_s0 + $0x58] sm:$0xff] }
   0x9   :  { %874 = vmatmul.mubr.msk.f32.gmra.mxu0 %vm86_vm1, %v17_v7  ;;  %922 = vmatmul.mubr.msk.f32.gmra.mxu1 %vm86_vm1, %v49_v8  ;;  %v57_v24 = vld [vmem:[%s1573_s0 + $0x158] sm:$0xff]  ;;  %v26_v25 = vld [vmem:[%s1573_s0 + $0x60] sm:$0xff]  ;;  %v27_v27 = vld [vmem:[%s1573_s0 + $0x68] sm:$0xff] }
   0xa   :  { %876 = vmatprep.mubr.msk.f32.mxu0 %vm86_vm1, %v18_v9  ;;  %924 = vmatprep.mubr.msk.f32.mxu1 %vm86_vm1, %v50_v10  ;;  %v58_v26 = vld [vmem:[%s1573_s0 + $0x160] sm:$0xff]  ;;  %v59_v28 = vld [vmem:[%s1573_s0 + $0x168] sm:$0xff]  ;;  %v28_v29 = vld [vmem:[%s1573_s0 + $0x70] sm:$0xff] }
   0xb   :  { %v60_v30 = vld [vmem:[%s1573_s0 + $0x170] sm:$0xff]  ;;  %v29_v31 = vld [vmem:[%s1573_s0 + $0x78] sm:$0xff]  ;;  %v30_v33 = vld [vmem:[%s1573_s0 + $0x80] sm:$0xff] }
   0xc   :  { %v61_v32 = vld [vmem:[%s1573_s0 + $0x178] sm:$0xff]  ;;  %v62_v34 = vld [vmem:[%s1573_s0 + $0x180] sm:$0xff]  ;;  %v31_v35 = vld [vmem:[%s1573_s0 + $0x88] sm:$0xff] }
   0xd   :  { %877 = vmatmul.mubr.msk.f32.gmra.mxu0 %vm86_vm1, %v19_v11  ;;  %925 = vmatmul.mubr.msk.f32.gmra.mxu1 %vm86_vm1, %v51_v12  ;;  %v63_v36 = vld [vmem:[%s1573_s0 + $0x188] sm:$0xff]  ;;  %v32_v37 = vld [vmem:[%s1573_s0 + $0x90] sm:$0xff]  ;;  %v33_v39 = vld [vmem:[%s1573_s0 + $0x98] sm:$0xff] }
   0xe   :  { %879 = vmatprep.mubr.msk.f32.mxu0 %vm86_vm1, %v20_v13  ;;  %927 = vmatprep.mubr.msk.f32.mxu1 %vm86_vm1, %v52_v14  ;;  %v64_v38 = vld [vmem:[%s1573_s0 + $0x190] sm:$0xff]  ;;  %v65_v40 = vld [vmem:[%s1573_s0 + $0x198] sm:$0xff]  ;;  %v34_v41 = vld [vmem:[%s1573_s0 + $0xa0] sm:$0xff] }
   0xf   :  { %v66_v42 = vld [vmem:[%s1573_s0 + $0x1a0] sm:$0xff]  ;;  %v35_v43 = vld [vmem:[%s1573_s0 + $0xa8] sm:$0xff]  ;;  %v36_v45 = vld [vmem:[%s1573_s0 + $0xb0] sm:$0xff] }
  0x10   :  { %v67_v44 = vld [vmem:[%s1573_s0 + $0x1a8] sm:$0xff]  ;;  %v68_v46 = vld [vmem:[%s1573_s0 + $0x1b0] sm:$0xff]  ;;  %v37_v47 = vld [vmem:[%s1573_s0 + $0xb8] sm:$0xff] }
  0x11   :  { %880 = vmatmul.mubr.msk.f32.gmra.mxu0 %vm86_vm1, %v21_v15  ;;  %928 = vmatmul.mubr.msk.f32.gmra.mxu1 %vm86_vm1, %v53_v16  ;;  %v69_v48 = vld [vmem:[%s1573_s0 + $0x1b8] sm:$0xff]  ;;  %v38_v49 = vld [vmem:[%s1573_s0 + $0xc0] sm:$0xff]  ;;  %v39_v51 = vld [vmem:[%s1573_s0 + $0xc8] sm:$0xff] }
  0x12   :  { %882 = vmatprep.mubr.msk.f32.mxu0 %vm86_vm1, %v22_v17  ;;  %930 = vmatprep.mubr.msk.f32.mxu1 %vm86_vm1, %v54_v18  ;;  %v70_v50 = vld [vmem:[%s1573_s0 + $0x1c0] sm:$0xff]  ;;  %v71_v52 = vld [vmem:[%s1573_s0 + $0x1c8] sm:$0xff]  ;;  %v40_v53 = vld [vmem:[%s1573_s0 + $0xd0] sm:$0xff] }
  0x13   :  { %v72_v54 = vld [vmem:[%s1573_s0 + $0x1d0] sm:$0xff]  ;;  %v41_v55 = vld [vmem:[%s1573_s0 + $0xd8] sm:$0xff]  ;;  %v42_v57 = vld [vmem:[%s1573_s0 + $0xe0] sm:$0xff] }
  0x14   :  { %v73_v56 = vld [vmem:[%s1573_s0 + $0x1d8] sm:$0xff]  ;;  %v74_v58 = vld [vmem:[%s1573_s0 + $0x1e0] sm:$0xff]  ;;  %v43_v59 = vld [vmem:[%s1573_s0 + $0xe8] sm:$0xff] }
  0x15   :  { %883 = vmatmul.mubr.msk.f32.gmra.mxu0 %vm86_vm1, %v23_v19  ;;  %931 = vmatmul.mubr.msk.f32.gmra.mxu1 %vm86_vm1, %v55_v20  ;;  %v75_v60 = vld [vmem:[%s1573_s0 + $0x1e8] sm:$0xff]  ;;  %v44_v61 = vld [vmem:[%s1573_s0 + $0xf0] sm:$0xff]  ;;  %v45_v63 = vld [vmem:[%s1573_s0 + $0xf8] sm:$0xff] }
  0x16   :  { %885 = vmatprep.mubr.msk.f32.mxu0 %vm86_vm1, %v24_v21  ;;  %933 = vmatprep.mubr.msk.f32.mxu1 %vm86_vm1, %v56_v22  ;;  %v76_v62 = vld [vmem:[%s1573_s0 + $0x1f0] sm:$0xff]  ;;  %v77_v0 = vld [vmem:[%s1573_s0 + $0x1f8] sm:$0xff]  ;;  %v1250_v1 = vld [vmem:[%s1574_s2] ss:$0 sm:$0xff] }
  0x19   :  { %886 = vmatmul.mubr.msk.f32.gmra.mxu0 %vm86_vm1, %v25_v23  ;;  %934 = vmatmul.mubr.msk.f32.gmra.mxu1 %vm86_vm1, %v57_v24 }
  0x1a   :  { %888 = vmatprep.mubr.msk.f32.mxu0 %vm86_vm1, %v26_v25  ;;  %936 = vmatprep.mubr.msk.f32.mxu1 %vm86_vm1, %v58_v26 }
  0x1d   :  { %889 = vmatmul.mubr.msk.f32.gmra.mxu0 %vm86_vm1, %v27_v27  ;;  %937 = vmatmul.mubr.msk.f32.gmra.mxu1 %vm86_vm1, %v59_v28 }
  0x1e   :  { %891 = vmatprep.mubr.msk.f32.mxu0 %vm86_vm1, %v28_v29  ;;  %939 = vmatprep.mubr.msk.f32.mxu1 %vm86_vm1, %v60_v30 }
  0x21   :  { %892 = vmatmul.mubr.msk.f32.gmra.mxu0 %vm86_vm1, %v29_v31  ;;  %940 = vmatmul.mubr.msk.f32.gmra.mxu1 %vm86_vm1, %v61_v32 }
  0x22   :  { %894 = vmatprep.mubr.msk.f32.mxu0 %vm86_vm1, %v30_v33  ;;  %942 = vmatprep.mubr.msk.f32.mxu1 %vm86_vm1, %v62_v34 }
  0x25   :  { %895 = vmatmul.mubr.msk.f32.gmra.mxu0 %vm86_vm1, %v31_v35  ;;  %943 = vmatmul.mubr.msk.f32.gmra.mxu1 %vm86_vm1, %v63_v36 }
  0x26   :  { %897 = vmatprep.mubr.msk.f32.mxu0 %vm86_vm1, %v32_v37  ;;  %945 = vmatprep.mubr.msk.f32.mxu1 %vm86_vm1, %v64_v38 }
  0x29   :  { %898 = vmatmul.mubr.msk.f32.gmra.mxu0 %vm86_vm1, %v33_v39  ;;  %946 = vmatmul.mubr.msk.f32.gmra.mxu1 %vm86_vm1, %v65_v40 }
  0x2a   :  { %900 = vmatprep.mubr.msk.f32.mxu0 %vm86_vm1, %v34_v41  ;;  %948 = vmatprep.mubr.msk.f32.mxu1 %vm86_vm1, %v66_v42 }
  0x2d   :  { %901 = vmatmul.mubr.msk.f32.gmra.mxu0 %vm86_vm1, %v35_v43  ;;  %949 = vmatmul.mubr.msk.f32.gmra.mxu1 %vm86_vm1, %v67_v44 }
  0x2e   :  { %903 = vmatprep.mubr.msk.f32.mxu0 %vm86_vm1, %v36_v45  ;;  %951 = vmatprep.mubr.msk.f32.mxu1 %vm86_vm1, %v68_v46 }
  0x31   :  { %904 = vmatmul.mubr.msk.f32.gmra.mxu0 %vm86_vm1, %v37_v47  ;;  %952 = vmatmul.mubr.msk.f32.gmra.mxu1 %vm86_vm1, %v69_v48 }
  0x32   :  { %906 = vmatprep.mubr.msk.f32.mxu0 %vm86_vm1, %v38_v49  ;;  %954 = vmatprep.mubr.msk.f32.mxu1 %vm86_vm1, %v70_v50 }
  0x35   :  { %907 = vmatmul.mubr.msk.f32.gmra.mxu0 %vm86_vm1, %v39_v51  ;;  %955 = vmatmul.mubr.msk.f32.gmra.mxu1 %vm86_vm1, %v71_v52 }
  0x36   :  { %909 = vmatprep.mubr.msk.f32.mxu0 %vm86_vm1, %v40_v53  ;;  %957 = vmatprep.mubr.msk.f32.mxu1 %vm86_vm1, %v72_v54 }
  0x39   :  { %910 = vmatmul.mubr.msk.f32.gmra.mxu0 %vm86_vm1, %v41_v55  ;;  %958 = vmatmul.mubr.msk.f32.gmra.mxu1 %vm86_vm1, %v73_v56 }
  0x3a   :  { %912 = vmatprep.mubr.msk.f32.mxu0 %vm86_vm1, %v42_v57  ;;  %960 = vmatprep.mubr.msk.f32.mxu1 %vm86_vm1, %v74_v58 }
  0x3d   :  { %913 = vmatmul.mubr.msk.f32.gmra.mxu0 %vm86_vm1, %v43_v59  ;;  %961 = vmatmul.mubr.msk.f32.gmra.mxu1 %vm86_vm1, %v75_v60 }
  0x3e   :  { %915 = vmatprep.mubr.msk.f32.mxu0 %vm86_vm1, %v44_v61  ;;  %963 = vmatprep.mubr.msk.f32.mxu1 %vm86_vm1, %v76_v62 }
  0x41   :  { %916 = vmatmul.mubr.msk.f32.gmra.mxu0 %vm86_vm1, %v45_v63  ;;  %964 = vmatmul.mubr.msk.f32.gmra.mxu1 %vm86_vm1, %v77_v0 }
  0xc5   :  { %v872_v2 = vpop.f32.mrf.mxu0  ;;  %v920_v3 = vpop.f32.mrf.mxu1 }
  0xc6   :  { %v355_v4 = vadd.f32 %v872_v2, %v1250_v1  ;;  %v515_v5 = vadd.f32 %v920_v3, %v1250_v1 }
  0xc7   :  { %v349_v6 = vpop.f32.mrf.mxu0  ;;  %v509_v7 = vpop.f32.mrf.mxu1 }
  0xc8   :  { %670 = vst.msk [vmem:[%s1575_s3 + $0x8] sm:$0xff] %vm668_vm2, %v355_v4  ;;  %702 = vst.msk [vmem:[%s1575_s3 + $0x108] sm:$0xff] %vm668_vm2, %v515_v5  ;;  %v350_v8 = vadd.f32 %v1250_v1, %v349_v6  ;;  %v510_v9 = vadd.f32 %v1250_v1, %v509_v7 }
  0xc9   :  { %v875_v10 = vpop.f32.mrf.mxu0  ;;  %v923_v11 = vpop.f32.mrf.mxu1 }
  0xca   :  { %669 = vst.msk [vmem:[%s1575_s3] sm:$0xff] %vm668_vm2, %v350_v8  ;;  %701 = vst.msk [vmem:[%s1575_s3 + $0x100] sm:$0xff] %vm668_vm2, %v510_v9  ;;  %v365_v12 = vadd.f32 %v875_v10, %v1250_v1  ;;  %v525_v13 = vadd.f32 %v923_v11, %v1250_v1 }
  0xcb   :  { %v359_v14 = vpop.f32.mrf.mxu0  ;;  %v519_v15 = vpop.f32.mrf.mxu1 }
  0xcc   :  { %672 = vst.msk [vmem:[%s1575_s3 + $0x18] sm:$0xff] %vm668_vm2, %v365_v12  ;;  %704 = vst.msk [vmem:[%s1575_s3 + $0x118] sm:$0xff] %vm668_vm2, %v525_v13  ;;  %v360_v16 = vadd.f32 %v1250_v1, %v359_v14  ;;  %v520_v17 = vadd.f32 %v1250_v1, %v519_v15 }
  0xcd   :  { %v878_v18 = vpop.f32.mrf.mxu0  ;;  %v926_v19 = vpop.f32.mrf.mxu1 }
  0xce   :  { %671 = vst.msk [vmem:[%s1575_s3 + $0x10] sm:$0xff] %vm668_vm2, %v360_v16  ;;  %703 = vst.msk [vmem:[%s1575_s3 + $0x110] sm:$0xff] %vm668_vm2, %v520_v17  ;;  %v375_v20 = vadd.f32 %v878_v18, %v1250_v1  ;;  %v535_v21 = vadd.f32 %v926_v19, %v1250_v1 }
  0xcf   :  { %v369_v22 = vpop.f32.mrf.mxu0  ;;  %v529_v23 = vpop.f32.mrf.mxu1 }
  0xd0   :  { %674 = vst.msk [vmem:[%s1575_s3 + $0x28] sm:$0xff] %vm668_vm2, %v375_v20  ;;  %706 = vst.msk [vmem:[%s1575_s3 + $0x128] sm:$0xff] %vm668_vm2, %v535_v21  ;;  %v370_v24 = vadd.f32 %v1250_v1, %v369_v22  ;;  %v530_v25 = vadd.f32 %v1250_v1, %v529_v23 }
  0xd1   :  { %v881_v26 = vpop.f32.mrf.mxu0  ;;  %v929_v27 = vpop.f32.mrf.mxu1 }
  0xd2   :  { %673 = vst.msk [vmem:[%s1575_s3 + $0x20] sm:$0xff] %vm668_vm2, %v370_v24  ;;  %705 = vst.msk [vmem:[%s1575_s3 + $0x120] sm:$0xff] %vm668_vm2, %v530_v25  ;;  %v385_v28 = vadd.f32 %v881_v26, %v1250_v1  ;;  %v545_v29 = vadd.f32 %v929_v27, %v1250_v1 }
  0xd3   :  { %v379_v30 = vpop.f32.mrf.mxu0  ;;  %v539_v31 = vpop.f32.mrf.mxu1 }
  0xd4   :  { %676 = vst.msk [vmem:[%s1575_s3 + $0x38] sm:$0xff] %vm668_vm2, %v385_v28  ;;  %708 = vst.msk [vmem:[%s1575_s3 + $0x138] sm:$0xff] %vm668_vm2, %v545_v29  ;;  %v380_v32 = vadd.f32 %v1250_v1, %v379_v30  ;;  %v540_v33 = vadd.f32 %v1250_v1, %v539_v31 }
  0xd5   :  { %v884_v34 = vpop.f32.mrf.mxu0  ;;  %v932_v35 = vpop.f32.mrf.mxu1 }
  0xd6   :  { %675 = vst.msk [vmem:[%s1575_s3 + $0x30] sm:$0xff] %vm668_vm2, %v380_v32  ;;  %707 = vst.msk [vmem:[%s1575_s3 + $0x130] sm:$0xff] %vm668_vm2, %v540_v33  ;;  %v395_v36 = vadd.f32 %v884_v34, %v1250_v1  ;;  %v555_v37 = vadd.f32 %v932_v35, %v1250_v1 }
  0xd7   :  { %v389_v38 = vpop.f32.mrf.mxu0  ;;  %v549_v39 = vpop.f32.mrf.mxu1 }
  0xd8   :  { %678 = vst.msk [vmem:[%s1575_s3 + $0x48] sm:$0xff] %vm668_vm2, %v395_v36  ;;  %710 = vst.msk [vmem:[%s1575_s3 + $0x148] sm:$0xff] %vm668_vm2, %v555_v37  ;;  %v390_v40 = vadd.f32 %v1250_v1, %v389_v38  ;;  %v550_v41 = vadd.f32 %v1250_v1, %v549_v39 }
  0xd9   :  { %v887_v42 = vpop.f32.mrf.mxu0  ;;  %v935_v43 = vpop.f32.mrf.mxu1 }
  0xda   :  { %677 = vst.msk [vmem:[%s1575_s3 + $0x40] sm:$0xff] %vm668_vm2, %v390_v40  ;;  %709 = vst.msk [vmem:[%s1575_s3 + $0x140] sm:$0xff] %vm668_vm2, %v550_v41  ;;  %v405_v44 = vadd.f32 %v887_v42, %v1250_v1  ;;  %v565_v45 = vadd.f32 %v935_v43, %v1250_v1 }
  0xdb   :  { %v399_v46 = vpop.f32.mrf.mxu0  ;;  %v559_v47 = vpop.f32.mrf.mxu1 }
  0xdc   :  { %680 = vst.msk [vmem:[%s1575_s3 + $0x58] sm:$0xff] %vm668_vm2, %v405_v44  ;;  %712 = vst.msk [vmem:[%s1575_s3 + $0x158] sm:$0xff] %vm668_vm2, %v565_v45  ;;  %v400_v48 = vadd.f32 %v1250_v1, %v399_v46  ;;  %v560_v49 = vadd.f32 %v1250_v1, %v559_v47 }
  0xdd   :  { %v890_v50 = vpop.f32.mrf.mxu0  ;;  %v938_v51 = vpop.f32.mrf.mxu1 }
  0xde   :  { %679 = vst.msk [vmem:[%s1575_s3 + $0x50] sm:$0xff] %vm668_vm2, %v400_v48  ;;  %711 = vst.msk [vmem:[%s1575_s3 + $0x150] sm:$0xff] %vm668_vm2, %v560_v49  ;;  %v415_v52 = vadd.f32 %v890_v50, %v1250_v1  ;;  %v575_v53 = vadd.f32 %v938_v51, %v1250_v1 }
  0xdf   :  { %v409_v54 = vpop.f32.mrf.mxu0  ;;  %v569_v55 = vpop.f32.mrf.mxu1 }
  0xe0   :  { %682 = vst.msk [vmem:[%s1575_s3 + $0x68] sm:$0xff] %vm668_vm2, %v415_v52  ;;  %714 = vst.msk [vmem:[%s1575_s3 + $0x168] sm:$0xff] %vm668_vm2, %v575_v53  ;;  %v410_v56 = vadd.f32 %v1250_v1, %v409_v54  ;;  %v570_v57 = vadd.f32 %v1250_v1, %v569_v55 }
  0xe1   :  { %v893_v58 = vpop.f32.mrf.mxu0  ;;  %v941_v59 = vpop.f32.mrf.mxu1 }
  0xe2   :  { %681 = vst.msk [vmem:[%s1575_s3 + $0x60] sm:$0xff] %vm668_vm2, %v410_v56  ;;  %713 = vst.msk [vmem:[%s1575_s3 + $0x160] sm:$0xff] %vm668_vm2, %v570_v57  ;;  %v425_v60 = vadd.f32 %v893_v58, %v1250_v1  ;;  %v585_v61 = vadd.f32 %v941_v59, %v1250_v1 }
  0xe3   :  { %v419_v62 = vpop.f32.mrf.mxu0  ;;  %v579_v63 = vpop.f32.mrf.mxu1 }
  0xe4   :  { %684 = vst.msk [vmem:[%s1575_s3 + $0x78] sm:$0xff] %vm668_vm2, %v425_v60  ;;  %716 = vst.msk [vmem:[%s1575_s3 + $0x178] sm:$0xff] %vm668_vm2, %v585_v61  ;;  %v420_v0 = vadd.f32 %v1250_v1, %v419_v62  ;;  %v580_v2 = vadd.f32 %v1250_v1, %v579_v63 }
  0xe5   :  { %v896_v3 = vpop.f32.mrf.mxu0  ;;  %v944_v4 = vpop.f32.mrf.mxu1 }
  0xe6   :  { %683 = vst.msk [vmem:[%s1575_s3 + $0x70] sm:$0xff] %vm668_vm2, %v420_v0  ;;  %715 = vst.msk [vmem:[%s1575_s3 + $0x170] sm:$0xff] %vm668_vm2, %v580_v2  ;;  %v435_v5 = vadd.f32 %v896_v3, %v1250_v1  ;;  %v595_v6 = vadd.f32 %v944_v4, %v1250_v1 }
  0xe7   :  { %v429_v7 = vpop.f32.mrf.mxu0  ;;  %v589_v8 = vpop.f32.mrf.mxu1 }
  0xe8   :  { %686 = vst.msk [vmem:[%s1575_s3 + $0x88] sm:$0xff] %vm668_vm2, %v435_v5  ;;  %718 = vst.msk [vmem:[%s1575_s3 + $0x188] sm:$0xff] %vm668_vm2, %v595_v6  ;;  %v430_v9 = vadd.f32 %v1250_v1, %v429_v7  ;;  %v590_v10 = vadd.f32 %v1250_v1, %v589_v8 }
  0xe9   :  { %v899_v11 = vpop.f32.mrf.mxu0  ;;  %v947_v12 = vpop.f32.mrf.mxu1 }
  0xea   :  { %685 = vst.msk [vmem:[%s1575_s3 + $0x80] sm:$0xff] %vm668_vm2, %v430_v9  ;;  %717 = vst.msk [vmem:[%s1575_s3 + $0x180] sm:$0xff] %vm668_vm2, %v590_v10  ;;  %v445_v13 = vadd.f32 %v899_v11, %v1250_v1  ;;  %v605_v14 = vadd.f32 %v947_v12, %v1250_v1 }
  0xeb   :  { %v439_v15 = vpop.f32.mrf.mxu0  ;;  %v599_v16 = vpop.f32.mrf.mxu1 }
  0xec   :  { %688 = vst.msk [vmem:[%s1575_s3 + $0x98] sm:$0xff] %vm668_vm2, %v445_v13  ;;  %720 = vst.msk [vmem:[%s1575_s3 + $0x198] sm:$0xff] %vm668_vm2, %v605_v14  ;;  %v440_v17 = vadd.f32 %v1250_v1, %v439_v15  ;;  %v600_v18 = vadd.f32 %v1250_v1, %v599_v16 }
  0xed   :  { %v902_v19 = vpop.f32.mrf.mxu0  ;;  %v950_v20 = vpop.f32.mrf.mxu1 }
  0xee   :  { %687 = vst.msk [vmem:[%s1575_s3 + $0x90] sm:$0xff] %vm668_vm2, %v440_v17  ;;  %719 = vst.msk [vmem:[%s1575_s3 + $0x190] sm:$0xff] %vm668_vm2, %v600_v18  ;;  %v455_v21 = vadd.f32 %v902_v19, %v1250_v1  ;;  %v615_v22 = vadd.f32 %v950_v20, %v1250_v1 }
  0xef   :  { %v449_v23 = vpop.f32.mrf.mxu0  ;;  %v609_v24 = vpop.f32.mrf.mxu1 }
  0xf0   :  { %690 = vst.msk [vmem:[%s1575_s3 + $0xa8] sm:$0xff] %vm668_vm2, %v455_v21  ;;  %722 = vst.msk [vmem:[%s1575_s3 + $0x1a8] sm:$0xff] %vm668_vm2, %v615_v22  ;;  %v450_v25 = vadd.f32 %v1250_v1, %v449_v23  ;;  %v610_v26 = vadd.f32 %v1250_v1, %v609_v24 }
  0xf1   :  { %v905_v27 = vpop.f32.mrf.mxu0  ;;  %v953_v28 = vpop.f32.mrf.mxu1 }
  0xf2   :  { %689 = vst.msk [vmem:[%s1575_s3 + $0xa0] sm:$0xff] %vm668_vm2, %v450_v25  ;;  %721 = vst.msk [vmem:[%s1575_s3 + $0x1a0] sm:$0xff] %vm668_vm2, %v610_v26  ;;  %v465_v29 = vadd.f32 %v905_v27, %v1250_v1  ;;  %v625_v30 = vadd.f32 %v953_v28, %v1250_v1 }
  0xf3   :  { %v459_v31 = vpop.f32.mrf.mxu0  ;;  %v619_v32 = vpop.f32.mrf.mxu1 }
  0xf4   :  { %692 = vst.msk [vmem:[%s1575_s3 + $0xb8] sm:$0xff] %vm668_vm2, %v465_v29  ;;  %724 = vst.msk [vmem:[%s1575_s3 + $0x1b8] sm:$0xff] %vm668_vm2, %v625_v30  ;;  %v460_v33 = vadd.f32 %v1250_v1, %v459_v31  ;;  %v620_v34 = vadd.f32 %v1250_v1, %v619_v32 }
  0xf5   :  { %v908_v35 = vpop.f32.mrf.mxu0  ;;  %v956_v36 = vpop.f32.mrf.mxu1 }
  0xf6   :  { %691 = vst.msk [vmem:[%s1575_s3 + $0xb0] sm:$0xff] %vm668_vm2, %v460_v33  ;;  %723 = vst.msk [vmem:[%s1575_s3 + $0x1b0] sm:$0xff] %vm668_vm2, %v620_v34  ;;  %v475_v37 = vadd.f32 %v908_v35, %v1250_v1  ;;  %v635_v38 = vadd.f32 %v956_v36, %v1250_v1 }
  0xf7   :  { %v469_v39 = vpop.f32.mrf.mxu0  ;;  %v629_v40 = vpop.f32.mrf.mxu1 }
  0xf8   :  { %694 = vst.msk [vmem:[%s1575_s3 + $0xc8] sm:$0xff] %vm668_vm2, %v475_v37  ;;  %726 = vst.msk [vmem:[%s1575_s3 + $0x1c8] sm:$0xff] %vm668_vm2, %v635_v38  ;;  %v470_v41 = vadd.f32 %v1250_v1, %v469_v39  ;;  %v630_v42 = vadd.f32 %v1250_v1, %v629_v40 }
  0xf9   :  { %v911_v43 = vpop.f32.mrf.mxu0  ;;  %v959_v44 = vpop.f32.mrf.mxu1 }
  0xfa   :  { %693 = vst.msk [vmem:[%s1575_s3 + $0xc0] sm:$0xff] %vm668_vm2, %v470_v41  ;;  %725 = vst.msk [vmem:[%s1575_s3 + $0x1c0] sm:$0xff] %vm668_vm2, %v630_v42  ;;  %v485_v45 = vadd.f32 %v911_v43, %v1250_v1  ;;  %v645_v46 = vadd.f32 %v959_v44, %v1250_v1 }
  0xfb   :  { %v479_v47 = vpop.f32.mrf.mxu0  ;;  %v639_v48 = vpop.f32.mrf.mxu1 }
  0xfc   :  { %696 = vst.msk [vmem:[%s1575_s3 + $0xd8] sm:$0xff] %vm668_vm2, %v485_v45  ;;  %728 = vst.msk [vmem:[%s1575_s3 + $0x1d8] sm:$0xff] %vm668_vm2, %v645_v46  ;;  %v480_v49 = vadd.f32 %v1250_v1, %v479_v47  ;;  %v640_v50 = vadd.f32 %v1250_v1, %v639_v48 }
  0xfd   :  { %v914_v51 = vpop.f32.mrf.mxu0  ;;  %v962_v52 = vpop.f32.mrf.mxu1 }
  0xfe   :  { %695 = vst.msk [vmem:[%s1575_s3 + $0xd0] sm:$0xff] %vm668_vm2, %v480_v49  ;;  %727 = vst.msk [vmem:[%s1575_s3 + $0x1d0] sm:$0xff] %vm668_vm2, %v640_v50  ;;  %v495_v53 = vadd.f32 %v914_v51, %v1250_v1  ;;  %v655_v54 = vadd.f32 %v962_v52, %v1250_v1 }
  0xff   :  { %v489_v55 = vpop.f32.mrf.mxu0  ;;  %v649_v56 = vpop.f32.mrf.mxu1 }
 0x100   :  { %698 = vst.msk [vmem:[%s1575_s3 + $0xe8] sm:$0xff] %vm668_vm2, %v495_v53  ;;  %730 = vst.msk [vmem:[%s1575_s3 + $0x1e8] sm:$0xff] %vm668_vm2, %v655_v54  ;;  %v490_v57 = vadd.f32 %v1250_v1, %v489_v55  ;;  %v650_v58 = vadd.f32 %v1250_v1, %v649_v56 }
 0x101   :  { %v917_v59 = vpop.f32.mrf.mxu0  ;;  %v965_v60 = vpop.f32.mrf.mxu1 }
 0x102   :  { %697 = vst.msk [vmem:[%s1575_s3 + $0xe0] sm:$0xff] %vm668_vm2, %v490_v57  ;;  %729 = vst.msk [vmem:[%s1575_s3 + $0x1e0] sm:$0xff] %vm668_vm2, %v650_v58  ;;  %v505_v61 = vadd.f32 %v917_v59, %v1250_v1  ;;  %v665_v62 = vadd.f32 %v965_v60, %v1250_v1 }
 0x103   :  { %v499_v63 = vpop.f32.mrf.mxu0  ;;  %v659_v0 = vpop.f32.mrf.mxu1 }
 0x104   :  { %700 = vst.msk [vmem:[%s1575_s3 + $0xf8] sm:$0xff] %vm668_vm2, %v505_v61  ;;  %732 = vst.msk [vmem:[%s1575_s3 + $0x1f8] sm:$0xff] %vm668_vm2, %v665_v62  ;;  %v500_v2 = vadd.f32 %v1250_v1, %v499_v63  ;;  %v660_v3 = vadd.f32 %v1250_v1, %v659_v0 }
 0x106   :  { %699 = vst.msk [vmem:[%s1575_s3 + $0xf0] sm:$0xff] %vm668_vm2, %v500_v2  ;;  %731 = vst.msk [vmem:[%s1575_s3 + $0x1f0] sm:$0xff] %vm668_vm2, %v660_v3 }

</bundles_post_ra>
